<compile_context>
chip_gen: v7x
topology: tpu7x:2x2x1
jax: 0.10.0
libtpu: 0.0.40
codegen_flags: <defaults>
</compile_context>

<pallas_src>
import functools

import jax
import jax.numpy as jnp
from jax import lax
from jax.experimental import pallas as pl
from jax.experimental.pallas import tpu as pltpu


def _round_up(x, m):
    return (x + m - 1) // m * m


def _fold_min_lanes(x, unit):
    """VPU-only elementwise min-fold of the last dim down to `unit` lanes."""
    k = x.shape[-1] // unit
    out = x[..., :unit]
    for g in range(1, k):
        out = jnp.minimum(out, x[..., g * unit:(g + 1) * unit])
    return out


def _fold_min_sublanes(x, unit):
    """VPU-only elementwise min-fold of the first dim down to `unit` sublanes."""
    k = x.shape[0] // unit
    out = x[:unit]
    for g in range(1, k):
        out = jnp.minimum(out, x[g * unit:(g + 1) * unit])
    return out


def _chamfer_kernel(p1_ref, p2t_ref, out_ref,
                    row_min_scr, col_min_scr, l1_acc, l2_acc,
                    *, n_true, m_true, tn, tm, col_sub, w1, w2,
                    mask_rows, mask_cols, precision):
    # p1_ref : (tn, 3)   tile of points1 for this batch
    # p2t_ref: (3, tm)   tile of points2 (transposed) for this batch
    # out_ref: (1, 1)    per-batch loss (written once, on the last tile)
    ni = pl.program_id(1)
    mi = pl.program_id(2)
    n_tiles = pl.num_programs(1)
    m_tiles = pl.num_programs(2)

    @pl.when(jnp.logical_and(ni == 0, mi == 0))
    def _():
        l1_acc[...] = jnp.zeros_like(l1_acc)
        l2_acc[...] = jnp.zeros_like(l2_acc)

    p1 = p1_ref[...].astype(jnp.float32)     # (tn, 3)
    p2t = p2t_ref[...].astype(jnp.float32)   # (3, tm)

    # Tiny per-tile squared norms.
    n1 = jnp.sum(p1 * p1, axis=1, keepdims=True)     # (tn, 1)
    n2 = jnp.sum(p2t * p2t, axis=0, keepdims=True)   # (1, tm)

    # Cross term on the MXU: -2 * p1 @ p2^T (the -2 is folded into the small
    # (3, tm) operand so the big tile needs no per-element multiply).
    cross = jnp.dot(p1, p2t * (-2.0),
                    preferred_element_type=jnp.float32,
                    precision=precision)             # (tn, tm)

    inf = jnp.float32(jnp.inf)
    # Padding masks folded into the SMALL norm vectors (no full-tile wheres).
    if mask_cols:
        col_ok = (mi * tm + lax.broadcasted_iota(jnp.int32, (1, tm), 1)) < m_true
        n2_inf = jnp.where(col_ok, n2, inf)
    else:
        n2_inf = n2
    if mask_rows:
        row_ok = (ni * tn + lax.broadcasted_iota(jnp.int32, (tn, 1), 0)) < n_true
        n1_inf = jnp.where(row_ok, n1, inf)
    else:
        n1_inf = n1

    # ---- loss1: per p1 row, min over p2 columns (accumulate over mi) --------
    row_cand = cross + n2_inf                        # ||p2_j||^2 - 2 p1_i.p2_j
    row_part = _fold_min_lanes(row_cand, 128)        # (tn, 128), VPU-only fold

    @pl.when(mi == 0)
    def _():
        row_min_scr[...] = row_part

    @pl.when(mi > 0)
    def _():
        row_min_scr[...] = jnp.minimum(row_min_scr[...], row_part)

    @pl.when(mi == m_tiles - 1)
    def _():
        # Single deferred 128-lane reduce, once per N-tile.
        row_min = jnp.min(row_min_scr[...], axis=1, keepdims=True)   # (tn, 1)
        row_final = jnp.maximum(row_min + n1, 0.0)   # add back ||p1_i||^2, clamp
        if mask_rows:
            row_final = jnp.where(row_ok, row_final, 0.0)
        l1_acc[...] = l1_acc[...] + jnp.sum(row_final, axis=(0, 1), keepdims=True)

    # ---- loss2: per p2 column, min over p1 rows (accumulate over ni) --------
    col_cand = cross + n1_inf                        # ||p1_i||^2 - 2 p1_i.p2_j
    if col_sub > 1:
        col_part = _fold_min_sublanes(col_cand, col_sub)   # (col_sub, tm), VPU
    else:
        col_part = jnp.min(col_cand, axis=0, keepdims=True)  # fallback (huge M)

    moff = pl.multiple_of(mi * tm, 128)

    @pl.when(ni == 0)
    def _():
        col_min_scr[:, pl.ds(moff, tm)] = col_part

    @pl.when(ni > 0)
    def _():
        col_min_scr[:, pl.ds(moff, tm)] = jnp.minimum(
            col_min_scr[:, pl.ds(moff, tm)], col_part)

    @pl.when(ni == n_tiles - 1)
    def _():
        # Single deferred sublane reduce, once per M-slab per batch.
        slab = col_min_scr[:, pl.ds(moff, tm)]
        col_min = jnp.min(slab, axis=0, keepdims=True)                # (1, tm)
        col_final = jnp.maximum(col_min + n2, 0.0)   # add back ||p2_j||^2, clamp
        if mask_cols:
            col_final = jnp.where(col_ok, col_final, 0.0)
        l2_acc[...] = l2_acc[...] + jnp.sum(col_final, axis=(0, 1), keepdims=True)

    # ---- finalize batch ------------------------------------------------------
    @pl.when(jnp.logical_and(ni == n_tiles - 1, mi == m_tiles - 1))
    def _():
        out_ref[...] = (w1 * (1.0 / n_true) * l1_acc[...]
                        + w2 * (1.0 / m_true) * l2_acc[...]).astype(out_ref.dtype)


def chamfer_distance_loss(points1, points2, w1=1.0, w2=1.0, each_batch=False,
                          *, tn=512, tm=2048,
                          cross_precision=lax.Precision.HIGHEST):
    # tn=512/tm=2048 (cross + candidate temporaries ~12 MiB f32) fits the
    # explicit vmem_limit below on v5e/v6e/v7x; on v6e larger tiles (e.g.
    # tn=1024 or tm=4096) amortize per-step overhead further.
    assert points1.ndim == 3 and points1.shape[-1] == 3
    assert points2.ndim == 3 and points2.shape[-1] == 3
    B, N, _ = points1.shape
    B2, M, _ = points2.shape
    assert B == B2

    tn = min(tn, _round_up(N, 8))
    tm = min(tm, _round_up(M, 128))
    n_pad = _round_up(N, tn)
    m_pad = _round_up(M, tm)

    p1 = points1.astype(jnp.float32)
    p2 = points2.astype(jnp.float32)

    # Pre-center both clouds with a common per-batch translation (Chamfer is
    # translation-invariant) to improve conditioning of the ||a||^2 + ||b||^2
    # - 2 a.b decomposition for off-origin data.
    center = 0.5 * (jnp.mean(p1, axis=1, keepdims=True)
                    + jnp.mean(p2, axis=1, keepdims=True))
    p1 = p1 - center
    p2 = p2 - center

    # points2 transposed so the point index sits on the lane axis.
    p2t = jnp.transpose(p2, (0, 2, 1))  # (B, 3, M)

    # Padded coordinates must stay zero so `cross` is always finite and the
    # +inf mask lives only in the norm vectors (no inf - inf / NaN paths).
    if n_pad != N:
        p1 = jnp.pad(p1, ((0, 0), (0, n_pad - N), (0, 0)))
    if m_pad != M:
        p2t = jnp.pad(p2t, ((0, 0), (0, 0), (0, m_pad - M)))

    # Column-min accumulator: 8 sublanes (lane/sublane-dense, VPU-only fold
    # per tile). v7x VMEM guard: for huge M fall back to a (1, m_pad) slab.
    col_sub = 8 if (8 * m_pad * 4) <= (8 << 20) else 1

    temporaries = 4 * 3 * tn * tm                     # cross + 2 candidates
    scratch = 4 * (tn * 128 + col_sub * m_pad + 2)
    inputs = 2 * 4 * (tn * 3 + 3 * tm)                # double-buffered tiles
    vmem_limit = int(min(max(2 * (temporaries + scratch + inputs), 32 << 20),
                         64 << 20))

    kernel = functools.partial(
        _chamfer_kernel,
        n_true=N, m_true=M, tn=tn, tm=tm, col_sub=col_sub,
        w1=float(w1), w2=float(w2),
        mask_rows=(n_pad != N), mask_cols=(m_pad != M),
        precision=cross_precision)

    per_batch = pl.pallas_call(
        kernel,
        out_shape=jax.ShapeDtypeStruct((B, 1, 1), jnp.float32),
        grid_spec=pltpu.PrefetchScalarGridSpec(
            num_scalar_prefetch=0,
            grid=(B, n_pad // tn, m_pad // tm),
            in_specs=[
                pl.BlockSpec((None, tn, 3), lambda b, i, j: (b, i, 0)),
                pl.BlockSpec((None, 3, tm), lambda b, i, j: (b, 0, j)),
            ],
            out_specs=pl.BlockSpec((None, 1, 1), lambda b, i, j: (b, 0, 0)),
            scratch_shapes=[
                pltpu.VMEM((tn, 128), jnp.float32),         # row-min (lane-dense)
                pltpu.VMEM((col_sub, m_pad), jnp.float32),  # col-min (sublane-dense)
                pltpu.VMEM((1, 1), jnp.float32),            # loss1 sum
                pltpu.VMEM((1, 1), jnp.float32),            # loss2 sum
            ]),
        compiler_params=pltpu.CompilerParams(
            dimension_semantics=("parallel", "arbitrary", "arbitrary"),
            vmem_limit_bytes=vmem_limit),
    )(p1, p2t)

    loss = per_batch[:, 0, 0]  # (B,)
    if not each_batch:
        loss = jnp.mean(loss)
    return loss


def _reference(points1, points2, w1=1.0, w2=1.0, each_batch=False):
    # Pure-JAX reference mirroring the PyTorch module.
    diff = points1[:, :, None, :] - points2[:, None, :, :]
    dist = jnp.sum(diff * diff, axis=3)
    dist1 = jnp.sqrt(dist) ** 2
    dist2 = jnp.sqrt(jnp.transpose(dist, (0, 2, 1))) ** 2
    loss1 = jnp.min(dist1, axis=2).mean(axis=1)
    loss2 = jnp.min(dist2, axis=2).mean(axis=1)
    loss = w1 * loss1 + w2 * loss2
    if not each_batch:
        loss = loss.mean()
    return loss


if __name__ == "__main__":
    key = jax.random.PRNGKey(0)
    k1, k2, k3, k4 = jax.random.split(key, 4)

    # Small shapes matching the module's contract: (B, N, 3) / (B, M, 3).
    B, N, M = 2, 16, 24
    points1 = jax.random.normal(k1, (B, N, 3), dtype=jnp.float32)
    points2 = jax.random.normal(k2, (B, M, 3), dtype=jnp.float32)

    loss = chamfer_distance_loss(points1, points2, w1=1.0, w2=1.0)
    jax.block_until_ready(loss)
    ref = _reference(points1, points2, w1=1.0, w2=1.0)
    assert jnp.allclose(loss, ref, atol=1e-4, rtol=1e-4), (loss, ref)

    loss_b = chamfer_distance_loss(points1, points2, w1=0.5, w2=2.0,
                                   each_batch=True)
    jax.block_until_ready(loss_b)
    ref_b = _reference(points1, points2, w1=0.5, w2=2.0, each_batch=True)
    assert jnp.allclose(loss_b, ref_b, atol=1e-4, rtol=1e-4), (loss_b, ref_b)

    # Multi-tile path: exercises both running-min accumulators, both padding
    # masks, and the off-origin pre-centering (small explicit tiles).
    Nb, Mb = 300, 200
    pa = 2.0 + jax.random.normal(k3, (B, Nb, 3), dtype=jnp.float32)
    pb = 2.0 + jax.random.normal(k4, (B, Mb, 3), dtype=jnp.float32)
    loss_t = chamfer_distance_loss(pa, pb, w1=1.0, w2=1.0, tn=64, tm=128)
    jax.block_until_ready(loss_t)
    ref_t = _reference(pa, pb, w1=1.0, w2=1.0)
    assert jnp.allclose(loss_t, ref_t, atol=1e-4, rtol=1e-4), (loss_t, ref_t)

    print("KERNEL_OK")
</pallas_src>

<mosaic_0001>
module attributes {stable_mosaic.version = 11 : i64} {
  func.func @_chamfer_kernel(%arg0: i32, %arg1: i32, %arg2: i32, %arg3: memref<1x16x3xf32, #tpu.memory_space<vmem>>, %arg4: memref<1x3x128xf32, #tpu.memory_space<vmem>>, %arg5: memref<1x1x1xf32, #tpu.memory_space<vmem>>, %arg6: memref<16x128xf32, #tpu.memory_space<vmem>>, %arg7: memref<8x128xf32, #tpu.memory_space<vmem>>, %arg8: memref<1x1xf32, #tpu.memory_space<vmem>>, %arg9: memref<1x1xf32, #tpu.memory_space<vmem>>) attributes {dimension_semantics = [#tpu.dimension_semantics<parallel>, #tpu.dimension_semantics<arbitrary>, #tpu.dimension_semantics<arbitrary>], iteration_bounds = array<i64: 2, 1, 1>, scalar_prefetch = 0 : i64, scratch_operands = 4 : i64, tpu.core_type = #tpu.core_type<tc>, window_params = [{transform_indices = @transform_0, window_bounds = array<i64: 1, 16, 3>}, {transform_indices = @transform_1, window_bounds = array<i64: 1, 3, 128>}, {transform_indices = @transform_2, window_bounds = array<i64: 1, 1, 1>}]} {
    %c0_i32 = arith.constant 0 : i32
    %0 = arith.cmpi eq, %arg1, %c0_i32 : i32
    %c0_i32_0 = arith.constant 0 : i32
    %1 = arith.cmpi eq, %arg2, %c0_i32_0 : i32
    %2 = arith.andi %0, %1 : i1
    %3 = arith.extui %2 : i1 to i32
    %c0_i32_1 = arith.constant 0 : i32
    %4 = arith.cmpi ne, %3, %c0_i32_1 : i32
    scf.if %4 {
      %cst_27 = arith.constant 0.000000e+00 : f32
      %58 = vector.broadcast %cst_27 : f32 to vector<1x1xf32>
      %c0_28 = arith.constant 0 : index
      %c0_29 = arith.constant 0 : index
      %59 = vector.load %arg8[%c0_28, %c0_29] : memref<1x1xf32, #tpu.memory_space<vmem>>, vector<1x1xf32>
      tpu.vector_store %arg8[%c0_28, %c0_29], %58 {strides = array<i32>} : memref<1x1xf32, #tpu.memory_space<vmem>>, vector<1x1xf32>,
      %cst_30 = arith.constant 0.000000e+00 : f32
      %60 = vector.broadcast %cst_30 : f32 to vector<1x1xf32>
      %c0_31 = arith.constant 0 : index
      %c0_32 = arith.constant 0 : index
      %61 = vector.load %arg9[%c0_31, %c0_32] : memref<1x1xf32, #tpu.memory_space<vmem>>, vector<1x1xf32>
      tpu.vector_store %arg9[%c0_31, %c0_32], %60 {strides = array<i32>} : memref<1x1xf32, #tpu.memory_space<vmem>>, vector<1x1xf32>,
    } else {
    }
    %c0 = arith.constant 0 : index
    %c0_2 = arith.constant 0 : index
    %c0_3 = arith.constant 0 : index
    %5 = vector.load %arg3[%c0, %c0_2, %c0_3] : memref<1x16x3xf32, #tpu.memory_space<vmem>>, vector<1x16x3xf32>
    %6 = vector.shape_cast %5 : vector<1x16x3xf32> to vector<16x3xf32>
    %c0_4 = arith.constant 0 : index
    %c0_5 = arith.constant 0 : index
    %c0_6 = arith.constant 0 : index
    %7 = vector.load %arg4[%c0_4, %c0_5, %c0_6] : memref<1x3x128xf32, #tpu.memory_space<vmem>>, vector<1x3x128xf32>
    %8 = vector.shape_cast %7 : vector<1x3x128xf32> to vector<3x128xf32>
    %9 = arith.mulf %6, %6 : vector<16x3xf32>
    %cst = arith.constant dense<0.000000e+00> : vector<16xf32>
    %10 = vector.multi_reduction <add>, %9, %cst [1] : vector<16x3xf32> to vector<16xf32>
    %11 = vector.shape_cast %10 : vector<16xf32> to vector<16x1xf32>
    %12 = arith.mulf %8, %8 : vector<3x128xf32>
    %cst_7 = arith.constant dense<0.000000e+00> : vector<128xf32>
    %13 = vector.multi_reduction <add>, %12, %cst_7 [0] : vector<3x128xf32> to vector<128xf32>
    %14 = vector.shape_cast %13 : vector<128xf32> to vector<1x128xf32>
    %cst_8 = arith.constant -2.000000e+00 : f32
    %15 = vector.broadcast %cst_8 : f32 to vector<3x128xf32>
    %16 = arith.mulf %8, %15 : vector<3x128xf32>
    %cst_9 = arith.constant dense<0.000000e+00> : vector<16x128xf32>
    %17 = tpu.matmul %6, %16, %cst_9 {dimension_numbers = #tpu.dot_dimension_numbers<[1], [0], [0], [1], [0, 0, 1, 1], [], []>, precision = #tpu.contract_precision<fp32>} : vector<16x3xf32>, vector<3x128xf32>, vector<16x128xf32> -> vector<16x128xf32>
    %c128_i32 = arith.constant 128 : i32
    %18 = arith.muli %arg2, %c128_i32 : i32
    %19 = tpu.iota {dimensions = array<i32: 1>} : vector<1x128xi32>
    %20 = vector.broadcast %18 : i32 to vector<1x128xi32>
    %21 = arith.addi %20, %19 : vector<1x128xi32>
    %c24_i32 = arith.constant 24 : i32
    %22 = vector.broadcast %c24_i32 : i32 to vector<1x128xi32>
    %23 = arith.cmpi slt, %21, %22 : vector<1x128xi32>
    %cst_10 = arith.constant 0x7F800000 : f32
    %24 = vector.broadcast %cst_10 : f32 to vector<1x128xf32>
    %25 = arith.select %23, %14, %24 : vector<1x128xi1>, vector<1x128xf32>
    %26 = vector.broadcast %25 : vector<1x128xf32> to vector<16x128xf32>
    %27 = arith.addf %17, %26 : vector<16x128xf32>
    %c0_i32_11 = arith.constant 0 : i32
    %28 = arith.cmpi eq, %arg2, %c0_i32_11 : i32
    %29 = arith.extui %28 : i1 to i32
    %c0_i32_12 = arith.constant 0 : i32
    %30 = arith.cmpi ne, %29, %c0_i32_12 : i32
    scf.if %30 {
      %c0_27 = arith.constant 0 : index
      %c0_28 = arith.constant 0 : index
      %58 = vector.load %arg6[%c0_27, %c0_28] : memref<16x128xf32, #tpu.memory_space<vmem>>, vector<16x128xf32>
      tpu.vector_store %arg6[%c0_27, %c0_28], %27 {strides = array<i32>} : memref<16x128xf32, #tpu.memory_space<vmem>>, vector<16x128xf32>,
    } else {
    }
    %c0_i32_13 = arith.constant 0 : i32
    %31 = arith.cmpi sgt, %arg2, %c0_i32_13 : i32
    %32 = arith.extui %31 : i1 to i32
    %c0_i32_14 = arith.constant 0 : i32
    %33 = arith.cmpi ne, %32, %c0_i32_14 : i32
    scf.if %33 {
      %c0_27 = arith.constant 0 : index
      %c0_28 = arith.constant 0 : index
      %58 = vector.load %arg6[%c0_27, %c0_28] : memref<16x128xf32, #tpu.memory_space<vmem>>, vector<16x128xf32>
      %59 = arith.minimumf %58, %27 : vector<16x128xf32>
      %c0_29 = arith.constant 0 : index
      %c0_30 = arith.constant 0 : index
      %60 = vector.load %arg6[%c0_29, %c0_30] : memref<16x128xf32, #tpu.memory_space<vmem>>, vector<16x128xf32>
      tpu.vector_store %arg6[%c0_29, %c0_30], %59 {strides = array<i32>} : memref<16x128xf32, #tpu.memory_space<vmem>>, vector<16x128xf32>,
    } else {
    }
    %c0_i32_15 = arith.constant 0 : i32
    %34 = arith.cmpi eq, %arg2, %c0_i32_15 : i32
    %35 = arith.extui %34 : i1 to i32
    %c0_i32_16 = arith.constant 0 : i32
    %36 = arith.cmpi ne, %35, %c0_i32_16 : i32
    scf.if %36 {
      %c0_27 = arith.constant 0 : index
      %c0_28 = arith.constant 0 : index
      %58 = vector.load %arg6[%c0_27, %c0_28] : memref<16x128xf32, #tpu.memory_space<vmem>>, vector<16x128xf32>
      %cst_29 = arith.constant dense<0x7F800000> : vector<16xf32>
      %59 = vector.multi_reduction <minimumf>, %58, %cst_29 [1] : vector<16x128xf32> to vector<16xf32>
      %60 = vector.shape_cast %59 : vector<16xf32> to vector<16x1xf32>
      %61 = arith.addf %60, %11 : vector<16x1xf32>
      %cst_30 = arith.constant 0.000000e+00 : f32
      %62 = vector.broadcast %cst_30 : f32 to vector<16x1xf32>
      %63 = arith.maximumf %61, %62 : vector<16x1xf32>
      %c0_31 = arith.constant 0 : index
      %c0_32 = arith.constant 0 : index
      %64 = vector.load %arg8[%c0_31, %c0_32] : memref<1x1xf32, #tpu.memory_space<vmem>>, vector<1x1xf32>
      %65 = vector.shape_cast %63 : vector<16x1xf32> to vector<1x16x1xf32>
      %cst_33 = arith.constant dense<0.000000e+00> : vector<1xf32>
      %66 = vector.multi_reduction <add>, %65, %cst_33 [1, 2] : vector<1x16x1xf32> to vector<1xf32>
      %67 = vector.shape_cast %66 : vector<1xf32> to vector<1x1x1xf32>
      %68 = vector.extract %67[0, 0, 0] : f32 from vector<1x1x1xf32>
      %69 = vector.broadcast %68 : f32 to vector<1x1xf32>
      %70 = arith.addf %64, %69 : vector<1x1xf32>
      %c0_34 = arith.constant 0 : index
      %c0_35 = arith.constant 0 : index
      %71 = vector.load %arg8[%c0_34, %c0_35] : memref<1x1xf32, #tpu.memory_space<vmem>>, vector<1x1xf32>
      tpu.vector_store %arg8[%c0_34, %c0_35], %70 {strides = array<i32>} : memref<1x1xf32, #tpu.memory_space<vmem>>, vector<1x1xf32>,
    } else {
    }
    %37 = vector.broadcast %11 : vector<16x1xf32> to vector<16x128xf32>
    %38 = arith.addf %17, %37 : vector<16x128xf32>
    %39 = vector.extract_strided_slice %38 {offsets = [0, 0], sizes = [8, 128], strides = [1, 1]} : vector<16x128xf32> to vector<8x128xf32>
    %40 = vector.extract_strided_slice %38 {offsets = [8, 0], sizes = [8, 128], strides = [1, 1]} : vector<16x128xf32> to vector<8x128xf32>
    %41 = arith.minimumf %39, %40 : vector<8x128xf32>
    %c128_i32_17 = arith.constant 128 : i32
    %42 = arith.muli %arg2, %c128_i32_17 : i32
    %43 = tpu.assume_multiple %42, 128 : i32
    %c0_i32_18 = arith.constant 0 : i32
    %44 = arith.cmpi eq, %arg1, %c0_i32_18 : i32
    %45 = arith.extui %44 : i1 to i32
    %c0_i32_19 = arith.constant 0 : i32
    %46 = arith.cmpi ne, %45, %c0_i32_19 : i32
    scf.if %46 {
      %c0_27 = arith.constant 0 : index
      %58 = arith.index_cast %43 : i32 to index
      %59 = vector.load %arg7[%c0_27, %58] : memref<8x128xf32, #tpu.memory_space<vmem>>, vector<8x128xf32>
      tpu.vector_store %arg7[%c0_27, %58], %41 {strides = array<i32>} : memref<8x128xf32, #tpu.memory_space<vmem>>, vector<8x128xf32>,
    } else {
    }
    %c0_i32_20 = arith.constant 0 : i32
    %47 = arith.cmpi sgt, %arg1, %c0_i32_20 : i32
    %48 = arith.extui %47 : i1 to i32
    %c0_i32_21 = arith.constant 0 : i32
    %49 = arith.cmpi ne, %48, %c0_i32_21 : i32
    scf.if %49 {
      %c0_27 = arith.constant 0 : index
      %58 = arith.index_cast %43 : i32 to index
      %59 = vector.load %arg7[%c0_27, %58] : memref<8x128xf32, #tpu.memory_space<vmem>>, vector<8x128xf32>
      %60 = arith.minimumf %59, %41 : vector<8x128xf32>
      %c0_28 = arith.constant 0 : index
      %61 = arith.index_cast %43 : i32 to index
      %62 = vector.load %arg7[%c0_28, %61] : memref<8x128xf32, #tpu.memory_space<vmem>>, vector<8x128xf32>
      tpu.vector_store %arg7[%c0_28, %61], %60 {strides = array<i32>} : memref<8x128xf32, #tpu.memory_space<vmem>>, vector<8x128xf32>,
    } else {
    }
    %c0_i32_22 = arith.constant 0 : i32
    %50 = arith.cmpi eq, %arg1, %c0_i32_22 : i32
    %51 = arith.extui %50 : i1 to i32
    %c0_i32_23 = arith.constant 0 : i32
    %52 = arith.cmpi ne, %51, %c0_i32_23 : i32
    scf.if %52 {
      %c0_27 = arith.constant 0 : index
      %58 = arith.index_cast %43 : i32 to index
      %59 = vector.load %arg7[%c0_27, %58] : memref<8x128xf32, #tpu.memory_space<vmem>>, vector<8x128xf32>
      %cst_28 = arith.constant dense<0x7F800000> : vector<128xf32>
      %60 = vector.multi_reduction <minimumf>, %59, %cst_28 [0] : vector<8x128xf32> to vector<128xf32>
      %61 = vector.shape_cast %60 : vector<128xf32> to vector<1x128xf32>
      %62 = arith.addf %61, %14 : vector<1x128xf32>
      %cst_29 = arith.constant 0.000000e+00 : f32
      %63 = vector.broadcast %cst_29 : f32 to vector<1x128xf32>
      %64 = arith.maximumf %62, %63 : vector<1x128xf32>
      %cst_30 = arith.constant 0.000000e+00 : f32
      %65 = vector.broadcast %cst_30 : f32 to vector<1x128xf32>
      %66 = arith.select %23, %64, %65 : vector<1x128xi1>, vector<1x128xf32>
      %c0_31 = arith.constant 0 : index
      %c0_32 = arith.constant 0 : index
      %67 = vector.load %arg9[%c0_31, %c0_32] : memref<1x1xf32, #tpu.memory_space<vmem>>, vector<1x1xf32>
      %68 = vector.shape_cast %66 : vector<1x128xf32> to vector<1x1x128xf32>
      %cst_33 = arith.constant dense<0.000000e+00> : vector<1xf32>
      %69 = vector.multi_reduction <add>, %68, %cst_33 [1, 2] : vector<1x1x128xf32> to vector<1xf32>
      %70 = vector.shape_cast %69 : vector<1xf32> to vector<1x1x1xf32>
      %71 = vector.extract %70[0, 0, 0] : f32 from vector<1x1x1xf32>
      %72 = vector.broadcast %71 : f32 to vector<1x1xf32>
      %73 = arith.addf %67, %72 : vector<1x1xf32>
      %c0_34 = arith.constant 0 : index
      %c0_35 = arith.constant 0 : index
      %74 = vector.load %arg9[%c0_34, %c0_35] : memref<1x1xf32, #tpu.memory_space<vmem>>, vector<1x1xf32>
      tpu.vector_store %arg9[%c0_34, %c0_35], %73 {strides = array<i32>} : memref<1x1xf32, #tpu.memory_space<vmem>>, vector<1x1xf32>,
    } else {
    }
    %c0_i32_24 = arith.constant 0 : i32
    %53 = arith.cmpi eq, %arg1, %c0_i32_24 : i32
    %c0_i32_25 = arith.constant 0 : i32
    %54 = arith.cmpi eq, %arg2, %c0_i32_25 : i32
    %55 = arith.andi %53, %54 : i1
    %56 = arith.extui %55 : i1 to i32
    %c0_i32_26 = arith.constant 0 : i32
    %57 = arith.cmpi ne, %56, %c0_i32_26 : i32
    scf.if %57 {
      %c0_27 = arith.constant 0 : index
      %c0_28 = arith.constant 0 : index
      %58 = vector.load %arg8[%c0_27, %c0_28] : memref<1x1xf32, #tpu.memory_space<vmem>>, vector<1x1xf32>
      %cst_29 = arith.constant 6.250000e-02 : f32
      %59 = vector.broadcast %cst_29 : f32 to vector<1x1xf32>
      %60 = arith.mulf %59, %58 : vector<1x1xf32>
      %c0_30 = arith.constant 0 : index
      %c0_31 = arith.constant 0 : index
      %61 = vector.load %arg9[%c0_30, %c0_31] : memref<1x1xf32, #tpu.memory_space<vmem>>, vector<1x1xf32>
      %cst_32 = arith.constant 0.0416666679 : f32
      %62 = vector.broadcast %cst_32 : f32 to vector<1x1xf32>
      %63 = arith.mulf %62, %61 : vector<1x1xf32>
      %64 = arith.addf %60, %63 : vector<1x1xf32>
      %c0_33 = arith.constant 0 : index
      %c0_34 = arith.constant 0 : index
      %c0_35 = arith.constant 0 : index
      %65 = vector.load %arg5[%c0_33, %c0_34, %c0_35] : memref<1x1x1xf32, #tpu.memory_space<vmem>>, vector<1x1x1xf32>
      %66 = vector.shape_cast %65 : vector<1x1x1xf32> to vector<1x1xf32>
      %67 = vector.shape_cast %64 : vector<1x1xf32> to vector<1x1x1xf32>
      tpu.vector_store %arg5[%c0_33, %c0_34, %c0_35], %67 {strides = array<i32>} : memref<1x1x1xf32, #tpu.memory_space<vmem>>, vector<1x1x1xf32>,
    } else {
    }
    return
  }
  func.func @transform_0(%arg0: i32, %arg1: i32, %arg2: i32) -> (i32, i32, i32) {
    %c0_i32 = arith.constant 0 : i32
    %c0_i32_0 = arith.constant 0 : i32
    return %arg0, %arg1, %c0_i32 : i32, i32, i32
  }
  func.func @transform_1(%arg0: i32, %arg1: i32, %arg2: i32) -> (i32, i32, i32) {
    %c0_i32 = arith.constant 0 : i32
    %c0_i32_0 = arith.constant 0 : i32
    return %arg0, %c0_i32, %arg2 : i32, i32, i32
  }
  func.func @transform_2(%arg0: i32, %arg1: i32, %arg2: i32) -> (i32, i32, i32) {
    %c0_i32 = arith.constant 0 : i32
    %c0_i32_0 = arith.constant 0 : i32
    %c0_i32_1 = arith.constant 0 : i32
    return %arg0, %c0_i32, %c0_i32_0 : i32, i32, i32
  }
}

</mosaic_0001>

<bundles_post_ra>
// kernel: tpu_custom_call.1
= control target key start
LH: loop header
LB: loop body
LE: loop exit
PB: predicated region body
PF: predicated region fallthrough
CT: control target
= control target key end

     0   :  { %s1068_s9 = smov 0   ;;  %s1070_s10 = smov 0   ;;  %s1122_s0 = inlined_call_operand.vmem [shape: f32[2,16,3], index: 0, kind: input, shape index: {}]   ;;  %s1123_s1 = inlined_call_operand.vmem [shape: f32[2,3,128], index: 1, kind: input, shape index: {}]   ;;  %s1124_s2 = inlined_call_operand.vmem [shape: f32[2,1,1], index: 2, kind: output, shape index: {}]  }
   0x1   :  { %s1072_s11 = smov 0  }
   0x2 LB: > { %s31_s12 = sadd.s32 1, %s1046_s10  ;;  %p934_p0 = scmp.ge.s32.totalorder %s1050_s11, 1  ;;  %s1050_s11 = sphi %s1072_s11, %s12_s11   ;;  %s1046_s10 = sphi %s1070_s10, %s1126_s10   ;;  %s1042_s9 = sphi %s1068_s9, %s1125_s9  }
   0x3   : > { %p33_p1 = scmp.ge.s32.totalorder %s31_s12, 2  ;;  %p152_p2 = scmp.lt.s32.totalorder %s1050_s11, 3 }
   0x5   : > { %s1128_s12 = smov (%p33_p1, %s31_s12), 0  ;;  %p153_p3 = pnand %p934_p0, %p152_p2 }
   0x6   : > { %p184_p4 = scmp.lt.s32.totalorder (!%p153_p3), %s1042_s9, 1  ;;  %vm217_vm0 = vcmask (!%p153_p3), 23552   ;;  %vm225_vm1 = vcmask (!%p153_p3), 1042432   ;;  %v733_v32 = vlaneseq (!%p153_p3)  ;;  %vm824_vm3 = vcmask (!%p153_p3), 1040384  }
   0x7   : > { %156 = sbr.rel (%p153_p3) target bundleno = 638 (0x27e), region = 28  ;;  %vm770_vm4 = vcmask (!%p153_p3), 7168   ;;  %vm209_vm5 = vcmask (!%p153_p3), 0  }
   0x8   : > { %v734_v35 = vand.u32 (!%p153_p3), 127, %v733_v32 }
   0xa   : > { %vm737_vm2 = vcmp.lt.s32.totalorder (!%p153_p3), %v734_v35, 24 }
   0xe   : > { %s1130_s9 = smov (!%p184_p4, %s1042_s9), 1 }
   0xf   : > { %s937_s13 = sshll.u32 %s1130_s9, 2  ;;  %s940_s17 = sshll.u32 %s1130_s9, 4 }
  0x10   : > { %s199_s16 = scalar_lea.vmem %s1123_s1, %s937_s13  ;;  %s191_s20 = scalar_lea.vmem %s1122_s0, %s940_s17 }
  0x11   : > { %v214_v0 = vld [vmem:[%s199_s16] sm:$0x7]  ;;  %v213_v3 = vld [vmem:[%s191_s20 + $0x8] sm:$0xff]  ;;  %s202_s25 = scalar_lea.vmem %s1124_s2, %s1130_s9 }
  0x12   : > { %v233_v1 = vmul.f32 -2.0, %v214_v0  ;;  %v212_v2 = vld [vmem:[%s191_s20] sm:$0xff]  ;;  %v238_v5 = vsel %vm217_vm0, %v213_v3, 0  ;;  %v216_v7 = vmul.f32 %v213_v3, %v213_v3  ;;  %v224_v26 = vmul.f32 %v214_v0, %v214_v0 }
  0x13   : > { %v235_v4 = vsel %vm217_vm0, %v212_v2, 0  ;;  %v215_v6 = vmul.f32 %v212_v2, %v212_v2  ;;  %v319_v10 = vand.u32 4294901760, %v238_v5 }
  0x14   : > { %v241_v8 = vsel %vm225_vm1, %v233_v1, 0  ;;  %v309_v9 = vand.u32 4294901760, %v235_v4  ;;  %v221_v16 = vsel %vm217_vm0, %v216_v7, 0.0  ;;  %v226_v27 = vsel %vm225_vm1, %v224_v26, 0.0 }
  0x15   : > { %v244_v11 = vand.u32 4294901760, %v241_v8  ;;  %v218_v12 = vsel %vm217_vm0, %v215_v6, 0.0  ;;  %v320_v14 = vsub.f32 %v238_v5, %v319_v10  ;;  %v227_v28 = vrot.slane %v226_v27, 4 }
  0x16   : > { %v310_v13 = vsub.f32 %v235_v4, %v309_v9  ;;  %219 = vadd.xlane.f32.xlu0 %v218_v12  ;;  %v1052_v5 = vmov 0.0  }
  0x17   : > { %974 = vmatprep.subr.mxu0 %v244_v11  ;;  %959 = vmatprep.subr.mxu1 %v244_v11  ;;  %v331_v15 = vsub.f32 %v241_v8, %v244_v11  ;;  %v321_v18 = vand.u32 4294901760, %v320_v14  ;;  %v228_v29 = vadd.f32 %v227_v28, %v226_v27  ;;  %210 = vst.msk [vmem:[#allocation4] sm:$0x1] %vm209_vm5, %v1052_v5  ;;  %211 = vst.msk [vmem:[#allocation5] sm:$0x1] %vm209_vm5, %v1052_v5 }
  0x18   : > { %975 = vmatpush3.msra.mxu0 %v244_v11  ;;  %v311_v17 = vand.u32 4294901760, %v310_v13  ;;  %960 = vmatpush3.msra.mxu1 %v244_v11 }
  0x19   : > { %v332_v19 = vand.u32 4294901760, %v331_v15  ;;  %v322_v21 = vsub.f32 %v320_v14, %v321_v18  ;;  %v229_v30 = vrot.slane %v228_v29, 2 }
  0x1a   : > { %976 = vmatprep.mubr.f32.mxu0 %v311_v17  ;;  %v312_v20 = vsub.f32 %v310_v13, %v311_v17  ;;  %222 = vadd.xlane.f32.xlu0 %v221_v16 }
  0x1b   : > { %977 = vmatmul.mubr.f32.vlgmr.msra.gmra.mrb[0].mxu0 %v321_v18  ;;  %v333_v22 = vsub.f32 %v331_v15, %v332_v19  ;;  %979 = vmatprep.subr.mxu0 %v332_v19  ;;  %v323_v24 = vand.u32 4294901760, %v322_v21  ;;  %v230_v31 = vadd.f32 %v229_v30, %v228_v29 }
  0x1c   : > { %v313_v23 = vand.u32 4294901760, %v312_v20  ;;  %980 = vmatpush3.msra.mxu0 %v332_v19  ;;  %981 = vmatprep.mubr.f32.mxu0 %v309_v9 }
  0x1d   : > { %v334_v25 = vand.u32 4294901760, %v333_v22  ;;  %984 = vmatprep.subr.mxu0 %v244_v11  ;;  %v231_v33 = vrot.slane %v230_v31, 1 }
  0x1e   : > { %961 = vmatprep.mubr.f32.mxu1 %v313_v23  ;;  %v769_v20 = vld [vmem:[#allocation4] sm:$0x1]  ;;  %v823_v21 = vld [vmem:[#allocation5] sm:$0x1] }
  0x1f   : > { %962 = vmatmul.mubr.f32.vlgmr.msra.gmra.mrb[0].mxu1 %v323_v24  ;;  %964 = vmatprep.subr.mxu1 %v334_v25  ;;  %v232_v38 = vadd.f32 %v231_v33, %v230_v31 }
  0x20   : > { %965 = vmatpush3.msra.mxu1 %v334_v25  ;;  %966 = vmatprep.mubr.f32.mxu1 %v309_v9 }
  0x21   : > { %969 = vmatprep.subr.mxu1 %v331_v15  ;;  %v738_v43 = vsel %vm737_vm2, %v232_v38, inf }
  0x23   : > { %982 = vmatmul.mubr.f32.vlgmr.msra.gmra.mrb[0].mxu0 %v319_v10 }
  0x24   : > { %985 = vmatpush3.msra.mxu0 %v244_v11  ;;  %986 = vmatprep.mubr.f32.mxu0 %v309_v9 }
  0x27   : > { %967 = vmatmul.mubr.f32.vlgmr.msra.gmra.mrb[0].mxu1 %v319_v10 }
  0x28   : > { %970 = vmatpush3.msra.mxu1 %v331_v15  ;;  %971 = vmatprep.mubr.f32.mxu1 %v310_v13 }
  0x2b   : > { %987 = vmatmul.mubr.f32.vlgmr.msra.gmra.mrb[0].mxu0 %v319_v10 }
  0x2f   : > { %972 = vmatmul.mubr.f32.vlgmr.msra.gmra.mrb[0].mxu1 %v320_v14 }
  0xa3   : > { %v220_v34 = vpop.xlane.xlu0 %219 }
  0xa7   : > { %v223_v40 = vpop.xlane.xlu0 %222 }
  0xfe   : > { %v988_v36 = vpop.f32.mrb[0].mxu0 }
  0xff   : > { %v722_v37 = vpop.f32.mrb[1].mxu0 }
 0x102   : > { %v973_v39 = vpop.f32.mrb[0].mxu1 }
 0x103   : > { %v989_v41 = vadd.f32 %v988_v36, %v973_v39  ;;  %v481_v42 = vpop.f32.mrb[1].mxu1 }
 0x104   : > { %v990_v44 = vadd.f32 %v722_v37, %v481_v42 }
 0x105   : > { %v788_v45 = vadd.f32 %v989_v41, %v223_v40  ;;  %v740_v50 = vadd.f32 %v989_v41, %v738_v43 }
 0x106   : > { %v787_v46 = vadd.f32 %v990_v44, %v220_v34  ;;  %v739_v47 = vadd.f32 %v990_v44, %v738_v43 }
 0x108   : > { %v789_v48 = vmin.f32 %v787_v46, %v788_v45  ;;  %761 = vmin.xlane.f32.xlu1 %v739_v47 }
 0x10a   : > { %v814_v49 = vrot.slane %v789_v48, 4 }
 0x10c   : > { %v815_v51 = vmin.f32 %v789_v48, %v814_v49  ;;  %763 = vmin.xlane.f32.xlu1 %v740_v50 }
 0x10e   : > { %v816_v52 = vrot.slane %v815_v51, 2 }
 0x110   : > { %v817_v53 = vmin.f32 %v815_v51, %v816_v52 }
 0x112   : > { %v818_v54 = vrot.slane %v817_v53, 1 }
 0x114   : > { %v819_v55 = vmin.f32 %v817_v53, %v818_v54 }
 0x116   : > { %v820_v56 = vadd.f32 %v819_v55, %v232_v38 }
 0x118   : > { %v821_v57 = vmax.f32 %v820_v56, 0.0 }
 0x11a   : > { %v822_v58 = vsel %vm737_vm2, %v821_v57, 0.0 }
 0x11b   : > { %v825_v59 = vsel %vm824_vm3, %v822_v58, 0.0 }
 0x11c   : > { %826 = vadd.xlane.f32.xlu1 %v825_v59 }
 0x195   : > { %v762_v60 = vpop.xlane.xlu1 %761 }
 0x196   : > { %v765_v61 = vadd.f32 %v762_v60, %v220_v34 }
 0x198   : > { %v767_v63 = vmax.f32 %v765_v61, 0.0 }
 0x199   : > { %v764_v62 = vpop.xlane.xlu1 %763 }
 0x19a   : > { %v766_v0 = vadd.f32 %v764_v62, %v223_v40  ;;  %v771_v2 = vsel %vm770_vm4, %v767_v63, 0.0 }
 0x19c   : > { %v768_v1 = vmax.f32 %v766_v0, 0.0 }
 0x19e   : > { %v772_v3 = vsel %vm770_vm4, %v768_v1, 0.0 }
 0x19f   : > { %v773_v4 = vadd.f32 %v772_v3, %v771_v2 }
 0x1a1   : > { %774 = vadd.xlane.f32.xlu0 %v773_v4 }
 0x1a9   : > { %v827_v6 = vpop.xlane.xlu1 %826 }
 0x1aa   : > { %v828_v7 = vrot.slane %v827_v6, 4 }
 0x1ac   : > { %v829_v8 = vadd.f32 %v828_v7, %v827_v6 }
 0x1ae   : > { %v830_v9 = vrot.slane %v829_v8, 2 }
 0x1b0   : > { %v831_v13 = vadd.f32 %v830_v9, %v829_v8 }
 0x1b2   : > { %v832_v16 = vrot.slane %v831_v13, 1 }
 0x1b4   : > { %v833_v19 = vadd.f32 %v832_v16, %v831_v13 }
 0x22e   : > { %v775_v10 = vpop.xlane.xlu0 %774 }
 0x22f   : > { %v776_v11 = vrot.slane %v775_v10, 4 }
 0x231   : > { %v777_v12 = vadd.f32 %v776_v11, %v775_v10 }
 0x233   : > { %v778_v14 = vrot.slane %v777_v12, 2 }
 0x235   : > { %v779_v15 = vadd.f32 %v778_v14, %v777_v12 }
 0x237   : > { %v780_v17 = vrot.slane %v779_v15, 1 }
 0x239   : > { %v781_v18 = vadd.f32 %v780_v17, %v779_v15 }
 0x23b   : > { %999 = vpush %v781_v18 }
 0x23c   : > { %1001 = vpush %v833_v19 }
 0x26c   : > { %s1000_s21 = spop %999 }
 0x26d   : > { %v783_v22 = vstv %s1000_s21  ;;  %s1002_s22 = spop %1001 }
 0x26e   : > { %v784_v23 = vadd.f32 %v783_v22, %v769_v20  ;;  %v835_v24 = vstv %s1002_s22 }
 0x26f   : > { %v836_v25 = vadd.f32 %v835_v24, %v823_v21 }
 0x270   : > { %786 = vst.msk [vmem:[#allocation4] sm:$0x1] %vm209_vm5, %v784_v23 }
 0x271   : > { %838 = vst.msk [vmem:[#allocation5] sm:$0x1] %vm209_vm5, %v836_v25 }
 0x277   : > { %v841_v26 = vld [vmem:[#allocation4] sm:$0x1] }
 0x278   : > { %v842_v27 = vmul.f32 0.0625, %v841_v26  ;;  %v843_v28 = vld [vmem:[#allocation5] sm:$0x1] }
 0x279   : > { %v844_v29 = vmul.f32 0.041666668, %v843_v28 }
 0x27b   : > { %v845_v30 = vadd.f32 %v844_v29, %v842_v27 }
 0x27d   : > { %847 = vst.msk [vmem:[%s202_s25] sm:$0x1] %vm209_vm5, %v845_v30 }
 0x27e PF: > { %s12_s11 = sadd.s32 1, %s1050_s11   ;;  %s1125_s9 = smov %s1046_s10 }
 0x27f   : > { %p9_p5 = scmp.ge.s32.totalorder %s12_s11, 4   ;;  %s1126_s10 = smov %s1128_s12 }
 0x281   :  { %11 = sbr.rel (!%p9_p5) target bundleno = 2 (0x2), region = 96 }

</bundles_post_ra>
